<compile_context>
chip_gen: v6e
topology: v6e:2x2x1
jax: 0.10.0
libtpu: 0.0.40
codegen_flags: <defaults>
</compile_context>

<pallas_src>
import functools

import jax
import jax.numpy as jnp
from jax.experimental import pallas as pl
from jax.experimental.pallas import tpu as pltpu

LANE = 128


def _round_up(n, m):
    return ((n + m - 1) // m) * m


def dae_kernel(x_ref, w1_ref, b1_ref, w2_ref, b2_ref, w3c_ref, b3c_ref, o_ref):
    # Layer 1: Linear + ReLU   (bf16 inputs, f32 accumulate)
    h = jnp.dot(x_ref[...], w1_ref[...],
                preferred_element_type=jnp.float32) + b1_ref[...]
    h = jnp.maximum(h, 0.0).astype(jnp.bfloat16)
    # Layer 2: Linear + ReLU
    h = jnp.dot(h, w2_ref[...],
                preferred_element_type=jnp.float32) + b2_ref[...]
    h = jnp.maximum(h, 0.0).astype(jnp.bfloat16)
    # Layers 3+4 folded: (h @ W3 + b3) @ Wc + bc == h @ (W3 @ Wc) + (b3 @ Wc + bc)
    y = jnp.dot(h, w3c_ref[...],
                preferred_element_type=jnp.float32) + b3c_ref[...]
    o_ref[...] = y.astype(o_ref.dtype)


@functools.partial(jax.jit, static_argnames=("batch_tile",))
def dae_forward(x, params, *, batch_tile=1024):
    """x: (B, input_dim) float32; params: dict of f32 weights/biases."""
    B, D_in = x.shape
    h1 = params["w1"].shape[1]
    h2 = params["w2"].shape[1]
    d_out = params["wc"].shape[1]

    # ---- param prep (cheap, constant-folded under jit) -------------------
    # Fold the activation-free final two linears.
    w3c = params["w3"] @ params["wc"]                       # (h2, d_out)
    b3c = params["b3"] @ params["wc"] + params["bc"]        # (1,  d_out)

    # Lane-dense output: pad folded weight/bias to a multiple of 128 lanes.
    d_pad = _round_up(d_out, LANE)
    w3c = jnp.pad(w3c, ((0, 0), (0, d_pad - d_out)))
    b3c = jnp.pad(b3c, ((0, 0), (0, d_pad - d_out)))

    # bf16 for everything that feeds the MXU; biases stay f32 (added post-dot).
    x_bf = x.astype(jnp.bfloat16)
    w1 = params["w1"].astype(jnp.bfloat16)
    w2 = params["w2"].astype(jnp.bfloat16)
    w3c = w3c.astype(jnp.bfloat16)
    b1 = params["b1"].astype(jnp.float32)
    b2 = params["b2"].astype(jnp.float32)
    b3c = b3c.astype(jnp.float32)

    # ---- batch tiling -----------------------------------------------------
    n_up = _round_up(B, 8)                     # sublane-aligned batch
    tm = min(batch_tile, n_up)
    if tm == n_up and n_up >= 16:
        # Prefer >= 2 grid steps so both TensorCores (v7x) get work.
        tm = _round_up(pl.cdiv(n_up, 2), 8)
    B_pad = _round_up(B, tm)
    if B_pad > B:
        x_bf = jnp.pad(x_bf, ((0, B_pad - B), (0, 0)))
    grid = (B_pad // tm,)

    # Weights / biases are tiny: give every grid step the full tensor.
    def full_spec(shape):
        return pl.BlockSpec(shape, lambda i, _s=shape: tuple(0 for _ in _s))

    y_full = pl.pallas_call(
        dae_kernel,
        out_shape=jax.ShapeDtypeStruct((B_pad, d_pad), jnp.float32),
        grid_spec=pltpu.PrefetchScalarGridSpec(
            num_scalar_prefetch=0,
            grid=grid,
            in_specs=[
                pl.BlockSpec((tm, D_in), lambda i: (i, 0)),   # x (batch-tiled)
                full_spec(w1.shape), full_spec(b1.shape),
                full_spec(w2.shape), full_spec(b2.shape),
                full_spec(w3c.shape), full_spec(b3c.shape),
            ],
            out_specs=pl.BlockSpec((tm, d_pad), lambda i: (i, 0)),
        ),
        compiler_params=pltpu.CompilerParams(
            dimension_semantics=("parallel",)),
    )(x_bf, w1, b1, w2, b2, w3c, b3c)

    return y_full[:B, :d_out]


def init_params(key, input_dim, hidden1, hidden2, hidden3, std=0.01):
    """Mirror dae.initialization(mean=0, std=0.01) + PyTorch default biases.

    PyTorch Linear stores weight as (out, in); we keep the transpose
    (in, out) so the kernel does x @ W. Biases follow PyTorch's default
    U(-1/sqrt(fan_in), 1/sqrt(fan_in)) init (untouched by dae.initialization).
    """
    assert hidden3 == 10, "cla expects Encoder output of size 10"
    k = jax.random.split(key, 8)

    def bias(kk, fan_in, n):
        bound = 1.0 / jnp.sqrt(fan_in)
        return jax.random.uniform(kk, (1, n), jnp.float32, -bound, bound)

    return {
        "w1": std * jax.random.normal(k[0], (input_dim, hidden1), jnp.float32),
        "b1": bias(k[1], input_dim, hidden1),
        "w2": std * jax.random.normal(k[2], (hidden1, hidden2), jnp.float32),
        "b2": bias(k[3], hidden1, hidden2),
        "w3": std * jax.random.normal(k[4], (hidden2, hidden3), jnp.float32),
        "b3": bias(k[5], hidden2, hidden3),
        "wc": std * jax.random.normal(k[6], (10, 10), jnp.float32),
        "bc": bias(k[7], 10, 10),
    }


def dae_reference(x, p):
    """Pure-JAX f32 reference of the PyTorch forward."""
    h = jnp.maximum(x @ p["w1"] + p["b1"], 0.0)
    h = jnp.maximum(h @ p["w2"] + p["b2"], 0.0)
    h = h @ p["w3"] + p["b3"]
    return h @ p["wc"] + p["bc"]


if __name__ == "__main__":
    # Small shapes consistent with the module: dae(input_dim=32, hidden1=32,
    # hidden2=16, hidden3=10); batch = 8.
    input_dim, hidden1, hidden2, hidden3 = 32, 32, 16, 10
    batch = 8

    key = jax.random.PRNGKey(0)
    kx, kp = jax.random.split(key)
    x = jax.random.normal(kx, (batch, input_dim), jnp.float32)
    params = init_params(kp, input_dim, hidden1, hidden2, hidden3)

    y = dae_forward(x, params)
    y = jax.block_until_ready(y)

    y_ref = dae_reference(x, params)
    assert y.shape == (batch, 10), y.shape
    # bf16 DMA + folded final linears change rounding slightly vs f32 ref.
    assert jnp.allclose(y, y_ref, atol=5e-3, rtol=5e-3), "mismatch vs reference"

    print("KERNEL_OK")
</pallas_src>

<mosaic_0001>
module attributes {stable_mosaic.version = 11 : i64} {
  func.func @dae_kernel(%arg0: i32, %arg1: memref<8x32xbf16, #tpu.memory_space<vmem>>, %arg2: memref<32x32xbf16, #tpu.memory_space<vmem>>, %arg3: memref<1x32xf32, #tpu.memory_space<vmem>>, %arg4: memref<32x16xbf16, #tpu.memory_space<vmem>>, %arg5: memref<1x16xf32, #tpu.memory_space<vmem>>, %arg6: memref<16x128xbf16, #tpu.memory_space<vmem>>, %arg7: memref<1x128xf32, #tpu.memory_space<vmem>>, %arg8: memref<8x128xf32, #tpu.memory_space<vmem>>) attributes {dimension_semantics = [#tpu.dimension_semantics<parallel>], iteration_bounds = array<i64: 1>, scalar_prefetch = 0 : i64, scratch_operands = 0 : i64, tpu.core_type = #tpu.core_type<tc>, window_params = [{transform_indices = @transform_0, window_bounds = array<i64: 8, 32>}, {pipeline_mode = #tpu.pipeline_mode<synchronous>, transform_indices = @transform_1, window_bounds = array<i64: 32, 32>}, {pipeline_mode = #tpu.pipeline_mode<synchronous>, transform_indices = @transform_2, window_bounds = array<i64: 1, 32>}, {pipeline_mode = #tpu.pipeline_mode<synchronous>, transform_indices = @transform_3, window_bounds = array<i64: 32, 16>}, {pipeline_mode = #tpu.pipeline_mode<synchronous>, transform_indices = @transform_4, window_bounds = array<i64: 1, 16>}, {pipeline_mode = #tpu.pipeline_mode<synchronous>, transform_indices = @transform_5, window_bounds = array<i64: 16, 128>}, {pipeline_mode = #tpu.pipeline_mode<synchronous>, transform_indices = @transform_6, window_bounds = array<i64: 1, 128>}, {transform_indices = @transform_7, window_bounds = array<i64: 8, 128>}]} {
    %c0 = arith.constant 0 : index
    %c0_0 = arith.constant 0 : index
    %0 = vector.load %arg1[%c0, %c0_0] : memref<8x32xbf16, #tpu.memory_space<vmem>>, vector<8x32xbf16>
    %c0_1 = arith.constant 0 : index
    %c0_2 = arith.constant 0 : index
    %1 = vector.load %arg2[%c0_1, %c0_2] : memref<32x32xbf16, #tpu.memory_space<vmem>>, vector<32x32xbf16>
    %cst = arith.constant dense<0.000000e+00> : vector<8x32xf32>
    %2 = tpu.matmul %0, %1, %cst {dimension_numbers = #tpu.dot_dimension_numbers<[1], [0], [0], [1], [0, 0, 1, 1], [], []>} : vector<8x32xbf16>, vector<32x32xbf16>, vector<8x32xf32> -> vector<8x32xf32>
    %c0_3 = arith.constant 0 : index
    %c0_4 = arith.constant 0 : index
    %3 = vector.load %arg3[%c0_3, %c0_4] : memref<1x32xf32, #tpu.memory_space<vmem>>, vector<1x32xf32>
    %4 = vector.broadcast %3 : vector<1x32xf32> to vector<8x32xf32>
    %5 = arith.addf %2, %4 : vector<8x32xf32>
    %cst_5 = arith.constant 0.000000e+00 : f32
    %6 = vector.broadcast %cst_5 : f32 to vector<8x32xf32>
    %7 = arith.maximumf %5, %6 : vector<8x32xf32>
    %8 = arith.truncf %7 : vector<8x32xf32> to vector<8x32xbf16>
    %c0_6 = arith.constant 0 : index
    %c0_7 = arith.constant 0 : index
    %9 = vector.load %arg4[%c0_6, %c0_7] : memref<32x16xbf16, #tpu.memory_space<vmem>>, vector<32x16xbf16>
    %cst_8 = arith.constant dense<0.000000e+00> : vector<8x16xf32>
    %10 = tpu.matmul %8, %9, %cst_8 {dimension_numbers = #tpu.dot_dimension_numbers<[1], [0], [0], [1], [0, 0, 1, 1], [], []>} : vector<8x32xbf16>, vector<32x16xbf16>, vector<8x16xf32> -> vector<8x16xf32>
    %c0_9 = arith.constant 0 : index
    %c0_10 = arith.constant 0 : index
    %11 = vector.load %arg5[%c0_9, %c0_10] : memref<1x16xf32, #tpu.memory_space<vmem>>, vector<1x16xf32>
    %12 = vector.broadcast %11 : vector<1x16xf32> to vector<8x16xf32>
    %13 = arith.addf %10, %12 : vector<8x16xf32>
    %cst_11 = arith.constant 0.000000e+00 : f32
    %14 = vector.broadcast %cst_11 : f32 to vector<8x16xf32>
    %15 = arith.maximumf %13, %14 : vector<8x16xf32>
    %16 = arith.truncf %15 : vector<8x16xf32> to vector<8x16xbf16>
    %c0_12 = arith.constant 0 : index
    %c0_13 = arith.constant 0 : index
    %17 = vector.load %arg6[%c0_12, %c0_13] : memref<16x128xbf16, #tpu.memory_space<vmem>>, vector<16x128xbf16>
    %cst_14 = arith.constant dense<0.000000e+00> : vector<8x128xf32>
    %18 = tpu.matmul %16, %17, %cst_14 {dimension_numbers = #tpu.dot_dimension_numbers<[1], [0], [0], [1], [0, 0, 1, 1], [], []>} : vector<8x16xbf16>, vector<16x128xbf16>, vector<8x128xf32> -> vector<8x128xf32>
    %c0_15 = arith.constant 0 : index
    %c0_16 = arith.constant 0 : index
    %19 = vector.load %arg7[%c0_15, %c0_16] : memref<1x128xf32, #tpu.memory_space<vmem>>, vector<1x128xf32>
    %20 = vector.broadcast %19 : vector<1x128xf32> to vector<8x128xf32>
    %21 = arith.addf %18, %20 : vector<8x128xf32>
    %c0_17 = arith.constant 0 : index
    %c0_18 = arith.constant 0 : index
    %22 = vector.load %arg8[%c0_17, %c0_18] : memref<8x128xf32, #tpu.memory_space<vmem>>, vector<8x128xf32>
    tpu.vector_store %arg8[%c0_17, %c0_18], %21 {strides = array<i32>} : memref<8x128xf32, #tpu.memory_space<vmem>>, vector<8x128xf32>,
    return
  }
  func.func @transform_0(%arg0: i32) -> (i32, i32) {
    %c0_i32 = arith.constant 0 : i32
    %c0_i32_0 = arith.constant 0 : i32
    return %arg0, %c0_i32 : i32, i32
  }
  func.func @transform_1(%arg0: i32) -> (i32, i32) {
    %c0_i32 = arith.constant 0 : i32
    %c0_i32_0 = arith.constant 0 : i32
    %c0_i32_1 = arith.constant 0 : i32
    return %c0_i32, %c0_i32_0 : i32, i32
  }
  func.func @transform_2(%arg0: i32) -> (i32, i32) {
    %c0_i32 = arith.constant 0 : i32
    %c0_i32_0 = arith.constant 0 : i32
    %c0_i32_1 = arith.constant 0 : i32
    return %c0_i32, %c0_i32_0 : i32, i32
  }
  func.func @transform_3(%arg0: i32) -> (i32, i32) {
    %c0_i32 = arith.constant 0 : i32
    %c0_i32_0 = arith.constant 0 : i32
    %c0_i32_1 = arith.constant 0 : i32
    return %c0_i32, %c0_i32_0 : i32, i32
  }
  func.func @transform_4(%arg0: i32) -> (i32, i32) {
    %c0_i32 = arith.constant 0 : i32
    %c0_i32_0 = arith.constant 0 : i32
    %c0_i32_1 = arith.constant 0 : i32
    return %c0_i32, %c0_i32_0 : i32, i32
  }
  func.func @transform_5(%arg0: i32) -> (i32, i32) {
    %c0_i32 = arith.constant 0 : i32
    %c0_i32_0 = arith.constant 0 : i32
    %c0_i32_1 = arith.constant 0 : i32
    return %c0_i32, %c0_i32_0 : i32, i32
  }
  func.func @transform_6(%arg0: i32) -> (i32, i32) {
    %c0_i32 = arith.constant 0 : i32
    %c0_i32_0 = arith.constant 0 : i32
    %c0_i32_1 = arith.constant 0 : i32
    return %c0_i32, %c0_i32_0 : i32, i32
  }
  func.func @transform_7(%arg0: i32) -> (i32, i32) {
    %c0_i32 = arith.constant 0 : i32
    %c0_i32_0 = arith.constant 0 : i32
    return %arg0, %c0_i32 : i32, i32
  }
}

</mosaic_0001>

<bundles_post_ra>
// kernel: dae_forward.1
= control target key start
LH: loop header
LB: loop body
LE: loop exit
PB: predicated region body
PF: predicated region fallthrough
CT: control target
= control target key end

     0   :  { %v311_v1 = vmov 0.0   ;;  %vm312_vm0 = vmmov 0   ;;  %s386_s0 = inlined_call_operand.vmem [shape: bf16[8,32], index: 0, kind: input, shape index: {}]   ;;  %s387_s1 = inlined_call_operand.vmem [shape: bf16[32,32], index: 1, kind: input, shape index: {}]   ;;  %s388_s2 = inlined_call_operand.vmem [shape: f32[1,32], index: 2, kind: input, shape index: {}]   ;;  %s389_s3 = inlined_call_operand.vmem [shape: bf16[32,16], index: 3, kind: input, shape index: {}]   ;;  %s390_s4 = inlined_call_operand.vmem [shape: f32[1,16], index: 4, kind: input, shape index: {}]   ;;  %s391_s5 = inlined_call_operand.vmem [shape: bf16[16,128], index: 5, kind: input, shape index: {}]   ;;  %s392_s6 = inlined_call_operand.vmem [shape: f32[1,128], index: 6, kind: input, shape index: {}]   ;;  %s393_s7 = inlined_call_operand.hbm [shape: f32[8,128], index: 7, kind: output, shape index: {}]  }
   0x1   :  { %v284_v0 = vld [vmem:[%s387_s1 + $0x8] sm:$0xff]   ;;  %259 = vmatprep.subr.bf16.mxu0 %v311_v1  ;;  %267 = vmatprep.subr.bf16.mxu1 %v311_v1  ;;  %v285_v2 = vld [vmem:[%s387_s1] sm:$0xff]  }
   0x2   :  { %260 = vmatpush3.bf16.msra.mxu0 %v284_v0  ;;  %263 = vmatprep.mubr.msk.bf16.mxu0 %vm312_vm0, %v311_v1 }
   0x3   :  { %261 = vmatprep.subr.bf16.mxu0 %v311_v1  ;;  %271 = vmatprep.mubr.msk.bf16.mxu1 %vm312_vm0, %v311_v1 }
   0x4   :  { %12 = vsyncpa [#allocation3], 0  ;;  %v28_v3 = vld [vmem:[%s386_s0] sm:$0xf]  ;;  %vm52_vm1 = vcmask 261120   ;;  %v286_v4 = vld [vmem:[%s389_s3 + $0x8] sm:$0xff]  }
   0x5   :  { %268 = vmatpush3.bf16.msra.mxu1 %v286_v4  ;;  %v287_v5 = vld [vmem:[%s389_s3] sm:$0xff]   ;;  %vm181_vm2 = vcmask 130048   ;;  %s313_s14 = smov [#allocation2]  }
   0x6   :  { %262 = vmatpush3.bf16.msra.mxu0 %v285_v2  ;;  %269 = vmatprep.subr.bf16.mxu1 %v311_v1  ;;  %v288_v6 = vld [vmem:[%s391_s5] sm:$0xff]   ;;  %s232_s15 = sshll.u32 %s313_s14, 4  ;;  %s233_s15 = int_to_ptr.vmem [resolvable:$true] %s232_s15 }
   0x7   :  { %275 = vmatprep.subr.bf16.mxu0 %v311_v1  ;;  %v240_v7 = vld [vmem:[%s388_s2] ss:$0 sm:$0xff]  ;;  %p294_p1 = scmp.lt.s32.totalorder %s233_s15, %s233_s15 }
   0x8   :  { %v244_v15 = vld [vmem:[%s390_s4] ss:$0 sm:$0xff]  ;;  %s289_s4 = scalar_lea.vmem %s233_s15, 128 }
   0x9   :  { %264 = vmatmul.mubr.msk.bf16.vlgmr.msra.gmra.mxu0 %vm52_vm1, %v28_v3  ;;  %270 = vmatpush3.bf16.msra.mxu1 %v287_v5  ;;  %v248_v23 = vld [vmem:[%s392_s6] ss:$0 sm:$0xff]  ;;  %p290_p0 = scmp.ne.s32.totalorder %s233_s15, %s289_s4  ;;  %p295_p2 = scmp.lt.s32.totalorder %s289_s4, %s289_s4 }
   0xa   :  { %277 = vmatprep.mubr.msk.bf16.mxu0 %vm312_vm0, %v311_v1  ;;  %276 = vmatpush3.bf16.msra.mxu0 %v288_v6 }
   0xb   :  { %p296_p3 = por %p295_p2, %p294_p1 }
   0xd   :  { %p297_p4 = pnand %p296_p3, %p290_p0 }
  0xc9   :  { %v90_v8 = vpop.f32.mrf.mxu0 }
  0xca   :  { %v91_v9 = vadd.f32 %v240_v7, %v90_v8 }
  0xcb   :  { %v265_v10 = vpop.f32.mrf.mxu0 }
  0xcc   :  { %v96_v11 = vmax.f32 %v91_v9, 0.0 }
  0xcd   :  { %v93_v12 = vpop.f32.mrf.mxu0 }
  0xce   :  { %v97_v13 = vpack.c.bf16 %v96_v11, %v96_v11 }
  0xcf   :  { %v266_v14 = vpop.f32.mrf.mxu0 }
  0xd0   :  { %272 = vmatmul.mubr.msk.bf16.vlgmr.msra.gmra.mxu1 %vm52_vm1, %v97_v13 }
 0x190   :  { %v158_v16 = vpop.f32.mrf.mxu1 }
 0x191   :  { %v159_v17 = vadd.f32 %v244_v15, %v158_v16 }
 0x192   :  { %v273_v18 = vpop.f32.mrf.mxu1 }
 0x193   :  { %v164_v19 = vmax.f32 %v159_v17, 0.0 }
 0x194   :  { %v161_v20 = vpop.f32.mrf.mxu1 }
 0x195   :  { %v165_v21 = vpack.c.bf16 %v164_v19, %v164_v19 }
 0x196   :  { %v274_v22 = vpop.f32.mrf.mxu1 }
 0x197   :  { %278 = vmatmul.mubr.msk.bf16.vlgmr.msra.gmra.mxu0 %vm181_vm2, %v165_v21 }
 0x257   :  { %v219_v24 = vpop.f32.mrf.mxu0 }
 0x258   :  { %v220_v25 = vadd.f32 %v248_v23, %v219_v24 }
 0x259   :  { %v279_v26 = vpop.f32.mrf.mxu0 }
 0x25a   :  { %225 = vst [vmem:[#allocation2] sm:$0xff] %v220_v25 }
 0x25b   :  { %v222_v27 = vpop.f32.mrf.mxu0 }
 0x25c   :  { %300 = shalt.err (!%p297_p4)
}
 0x25d   :  { %235 = dma.vmem_to_hbm [thread:$0]  %s233_s15, 128, %s393_s7, [#allocation3]   ;;  %v280_v28 = vpop.f32.mrf.mxu0 }
 0x25e   :  { %309 = dma.done.wait [#allocation3], 128  }
 0x25f   :  { %310 = vsyncadd [#allocation3], 4294967168 }
 0x260   :  { %239 = vsyncpa [#allocation3], 1 }

</bundles_post_ra>
